<compile_context>
chip_gen: v7x
topology: tpu7x:2x2x1
jax: 0.10.0
libtpu: 0.0.40
codegen_flags: <defaults>
</compile_context>

<pallas_src>
import jax
import jax.numpy as jnp
from jax import lax
from jax.experimental import pallas as pl
from jax.experimental.pallas import tpu as pltpu

EPS = 1e-5


def _resblock_kernel(x_ref, w1_ref, b1_ref, ws_ref, bs_ref, w2_ref, b2_ref,
                     out_ref, xrows_ref, hrows_ref):
    Nb, H, wc_in = x_ref.shape
    wc_out = out_ref.shape[2]
    Hh = H + 2                      # per-image rows incl. 1-row top/bottom halo
    M = Nb * Hh                     # stacked rows in the halo scratch
    f32 = jnp.float32
    bf16 = jnp.bfloat16

    # Stage the Nb images into the stacked halo scratch and zero each image's two halo rows.
    # Re-zeroed every step (no program_id==0 init) so it stays correct when the 'parallel'
    # batch axis is split across TensorCores (megacore / v7x).
    for i in range(Nb):
        base = i * Hh
        xrows_ref[base:base + 1, :] = jnp.zeros((1, wc_in), f32)
        xrows_ref[base + H + 1:base + H + 2, :] = jnp.zeros((1, wc_in), f32)
        hrows_ref[base:base + 1, :] = jnp.zeros((1, wc_out), f32)
        hrows_ref[base + H + 1:base + H + 2, :] = jnp.zeros((1, wc_out), f32)
        xrows_ref[base + 1:base + 1 + H, :] = x_ref[i].astype(f32)

    # conv1 (+ folded BN1 + bias).  acc1[j] is the conv1 output for stacked-buffer position
    # j + 1; the rows that straddle two images are garbage and are simply never stored.
    acc1 = jnp.dot(xrows_ref[0:M - 2, :].astype(bf16), w1_ref[0],
                   preferred_element_type=f32)
    for dy in range(1, 3):
        acc1 = acc1 + jnp.dot(xrows_ref[dy:M - 2 + dy, :].astype(bf16), w1_ref[dy],
                              preferred_element_type=f32)
    h = jnp.maximum(acc1 + b1_ref[...], 0.0)        # relu(norm1(conv1(x)))
    # TODO(synk): torch.nn.Dropout is stochastic in train mode; identity here (eval mode).

    # 1x1 shortcut on the (unshifted) valid x rows -- its own matmul, no zero columns.
    sc = jnp.dot(xrows_ref[1:M - 1, :].astype(bf16), ws_ref[...],
                 preferred_element_type=f32) + bs_ref[...]

    # Stage h's valid rows into the haloed conv2 input scratch.
    for i in range(Nb):
        base = i * Hh
        hrows_ref[base + 1:base + 1 + H, :] = h[base:base + H, :]

    # conv2 (+ folded BN2 + bias), add shortcut, final relu; store valid rows per image.
    acc2 = jnp.dot(hrows_ref[0:M - 2, :].astype(bf16), w2_ref[0],
                   preferred_element_type=f32)
    for dy in range(1, 3):
        acc2 = acc2 + jnp.dot(hrows_ref[dy:M - 2 + dy, :].astype(bf16), w2_ref[dy],
                              preferred_element_type=f32)
    out = jnp.maximum(acc2 + b2_ref[...] + sc, 0.0)
    for i in range(Nb):
        out_ref[i] = out[i * Hh:i * Hh + H, :]


def _fold_bn(w, b, gamma, beta, mean, var):
    """Fold eval-mode BatchNorm2d (general running stats) + conv bias into the conv weights.

    y = gamma*(conv(x)+b - mean)/sqrt(var+eps) + beta  ==  conv(x)*s + ((b-mean)*s + beta).
    """
    s = gamma.reshape(-1) * lax.rsqrt(var.reshape(-1) + EPS)                 # (Cout,)
    return w * s, (b.reshape(-1) - mean.reshape(-1)) * s + beta.reshape(-1)  # (3,3,Ci,Co),(Co,)


def _banded_conv_weight(w, W):
    """(3,3,Cin,Cout) HWIO conv weight -> (3, W*Cin, W*Cout) per-dy banded matmul weights.

    band[dy, (x+dx-1)*Cin + c, x*Cout + o] = w[dy, dx, c, o]; taps falling outside [0, W)
    are dropped, which implements 'same' zero padding along the width axis.
    """
    bands = []
    for dy in range(3):
        acc = None
        for dx in range(3):
            shift = jnp.eye(W, W, k=1 - dx, dtype=jnp.float32)  # S[i,x] = 1 iff i == x+dx-1
            term = jnp.kron(shift, w[dy, dx])
            acc = term if acc is None else acc + term
        bands.append(acc)
    return jnp.stack(bands)


def _pick_batch_tile(N, H):
    """Images per grid step: target ~128 stacked rows (v5e MXU height; fine on v6e/v7x),
    but keep >= 2 grid steps so both v7x TensorCores get work on the 'parallel' axis."""
    Hh = H + 2
    nb = max(1, min(N, 128 // Hh))
    if N > 1 and (N + nb - 1) // nb < 2:
        nb = max(1, N // 2)
    return nb


def residual_block_forward(x_nchw, params):
    """x_nchw: (N, Cin, H, W) float32 -> (N, Cout, H, W) float32."""
    (w1, b1, g1, be1, m1, v1, w2, b2, g2, be2, m2, v2, ws, bs) = params
    N, Cin, H, W = x_nchw.shape
    Cout = w1.shape[-1]
    wc_in, wc_out = W * Cin, W * Cout

    # ---- fold BN(eval) + conv biases; build banded per-dy weights (wrapper, once) ----
    w1f, b1f = _fold_bn(w1, b1, g1, be1, m1, v1)
    w2f, b2f = _fold_bn(w2, b2, g2, be2, m2, v2)
    w1_band = _banded_conv_weight(w1f, W).astype(jnp.bfloat16)       # (3, W*Cin,  W*Cout)
    w2_band = _banded_conv_weight(w2f, W).astype(jnp.bfloat16)       # (3, W*Cout, W*Cout)
    ws_band = jnp.kron(jnp.eye(W, dtype=jnp.float32), ws).astype(jnp.bfloat16)  # (W*Cin, W*Cout)
    # TODO(synk): before scaling W/C (esp. on v7x's 64 MiB VMEM), W-tile the block-tridiagonal
    # band (it is O(W^2) with ~3/W nonzero) and single-buffer these grid-invariant operands.

    b1t = jnp.tile(b1f, W)[None, :]                                  # (1, W*Cout) f32
    b2t = jnp.tile(b2f, W)[None, :]
    bst = jnp.tile(bs.reshape(-1), W)[None, :]

    # ---- batch tiling: Nb images per grid step ----
    Nb = _pick_batch_tile(N, H)
    grid_n = (N + Nb - 1) // Nb
    N_pad = grid_n * Nb
    Hh = H + 2

    # NCHW -> (N, H, W*Cin): channels-last, row-flattened, bf16; no host-side spatial padding.
    x_rows = jnp.transpose(x_nchw, (0, 2, 3, 1)).reshape(N, H, wc_in)
    if N_pad != N:
        x_rows = jnp.concatenate(
            [x_rows, jnp.zeros((N_pad - N, H, wc_in), x_rows.dtype)], axis=0)
    x_rows = x_rows.astype(jnp.bfloat16)

    out_rows = pl.pallas_call(
        _resblock_kernel,
        out_shape=jax.ShapeDtypeStruct((N_pad, H, wc_out), jnp.float32),
        grid_spec=pltpu.PrefetchScalarGridSpec(
            num_scalar_prefetch=0,
            grid=(grid_n,),
            in_specs=[
                pl.BlockSpec((Nb, H, wc_in), lambda n: (n, 0, 0)),        # x rows (bf16)
                pl.BlockSpec((3, wc_in, wc_out), lambda n: (0, 0, 0)),    # conv1 band (bf16)
                pl.BlockSpec((1, wc_out), lambda n: (0, 0)),              # folded bias 1
                pl.BlockSpec((wc_in, wc_out), lambda n: (0, 0)),          # shortcut band (bf16)
                pl.BlockSpec((1, wc_out), lambda n: (0, 0)),              # shortcut bias
                pl.BlockSpec((3, wc_out, wc_out), lambda n: (0, 0, 0)),   # conv2 band (bf16)
                pl.BlockSpec((1, wc_out), lambda n: (0, 0)),              # folded bias 2
            ],
            out_specs=pl.BlockSpec((Nb, H, wc_out), lambda n: (n, 0, 0)), # lane-dense output
            scratch_shapes=[
                pltpu.VMEM((Nb * Hh, wc_in), jnp.float32),   # stacked x rows + per-image halos
                pltpu.VMEM((Nb * Hh, wc_out), jnp.float32),  # stacked h rows + per-image halos
            ],
        ),
        compiler_params=pltpu.CompilerParams(
            dimension_semantics=("parallel",)),
    )(x_rows, w1_band, b1t, ws_band, bst, w2_band, b2t)

    out_rows = out_rows[:N]
    return jnp.transpose(out_rows.reshape(N, H, W, Cout), (0, 3, 1, 2))    # NHWC -> NCHW


def reference_forward(x_nchw, params):
    """Pure-JAX reference (unfused NHWC convs, f32) for correctness checking."""
    (w1, b1, g1, be1, m1, v1, w2, b2, g2, be2, m2, v2, ws, bs) = params
    x = jnp.transpose(x_nchw, (0, 2, 3, 1))
    dn = ('NHWC', 'HWIO', 'NHWC')

    h = lax.conv_general_dilated(x, w1, (1, 1), 'SAME', dimension_numbers=dn) + b1
    h = (h - m1) * (g1 * lax.rsqrt(v1 + EPS)) + be1
    h = jnp.maximum(h, 0.0)
    h2 = lax.conv_general_dilated(h, w2, (1, 1), 'SAME', dimension_numbers=dn) + b2
    h2 = (h2 - m2) * (g2 * lax.rsqrt(v2 + EPS)) + be2
    sc = jnp.einsum('nhwc,cd->nhwd', x, ws) + bs
    out = jnp.maximum(h2 + sc, 0.0)
    return jnp.transpose(out, (0, 3, 1, 2))


def make_params(key, Cin, Cout):
    ks = jax.random.split(key, 14)
    w1 = 0.2 * jax.random.normal(ks[0], (3, 3, Cin, Cout), jnp.float32)    # HWIO
    b1 = 0.1 * jax.random.normal(ks[1], (1, Cout), jnp.float32)
    g1 = 1.0 + 0.1 * jax.random.normal(ks[2], (1, Cout), jnp.float32)
    be1 = 0.1 * jax.random.normal(ks[3], (1, Cout), jnp.float32)
    m1 = 0.1 * jax.random.normal(ks[4], (1, Cout), jnp.float32)            # BN running mean
    v1 = jnp.exp(0.2 * jax.random.normal(ks[5], (1, Cout), jnp.float32))   # BN running var
    w2 = 0.2 * jax.random.normal(ks[6], (3, 3, Cout, Cout), jnp.float32)
    b2 = 0.1 * jax.random.normal(ks[7], (1, Cout), jnp.float32)
    g2 = 1.0 + 0.1 * jax.random.normal(ks[8], (1, Cout), jnp.float32)
    be2 = 0.1 * jax.random.normal(ks[9], (1, Cout), jnp.float32)
    m2 = 0.1 * jax.random.normal(ks[10], (1, Cout), jnp.float32)
    v2 = jnp.exp(0.2 * jax.random.normal(ks[11], (1, Cout), jnp.float32))
    ws = 0.2 * jax.random.normal(ks[12], (Cin, Cout), jnp.float32)         # 1x1 shortcut
    bs = 0.1 * jax.random.normal(ks[13], (1, Cout), jnp.float32)
    return (w1, b1, g1, be1, m1, v1, w2, b2, g2, be2, m2, v2, ws, bs)


if __name__ == "__main__":
    key = jax.random.PRNGKey(0)
    kx, kp = jax.random.split(key)

    N, Cin, Cout, H, W = 2, 4, 8, 16, 16
    x = jax.random.normal(kx, (N, Cin, H, W), jnp.float32)
    params = make_params(kp, Cin, Cout)

    out = jax.block_until_ready(jax.jit(residual_block_forward)(x, params))
    ref = jax.block_until_ready(reference_forward(x, params))

    assert out.shape == (N, Cout, H, W)
    # bf16 weights/activations feed the MXU (f32 accumulation) -> loosened tolerance.
    err = float(jnp.max(jnp.abs(out - ref)))
    assert jnp.allclose(out, ref, atol=1e-1, rtol=5e-2), err

    print("KERNEL_OK")
</pallas_src>

<mosaic_0001>
module attributes {stable_mosaic.version = 11 : i64} {
  func.func @_resblock_kernel(%arg0: i32, %arg1: memref<1x16x64xbf16, #tpu.memory_space<vmem>>, %arg2: memref<3x64x128xbf16, #tpu.memory_space<vmem>>, %arg3: memref<1x128xf32, #tpu.memory_space<vmem>>, %arg4: memref<64x128xbf16, #tpu.memory_space<vmem>>, %arg5: memref<1x128xf32, #tpu.memory_space<vmem>>, %arg6: memref<3x128x128xbf16, #tpu.memory_space<vmem>>, %arg7: memref<1x128xf32, #tpu.memory_space<vmem>>, %arg8: memref<1x16x128xf32, #tpu.memory_space<vmem>>, %arg9: memref<18x64xf32, #tpu.memory_space<vmem>>, %arg10: memref<18x128xf32, #tpu.memory_space<vmem>>) attributes {dimension_semantics = [#tpu.dimension_semantics<parallel>], iteration_bounds = array<i64: 2>, scalar_prefetch = 0 : i64, scratch_operands = 2 : i64, tpu.core_type = #tpu.core_type<tc>, window_params = [{transform_indices = @transform_0, window_bounds = array<i64: 1, 16, 64>}, {pipeline_mode = #tpu.pipeline_mode<synchronous>, transform_indices = @transform_1, window_bounds = array<i64: 3, 64, 128>}, {pipeline_mode = #tpu.pipeline_mode<synchronous>, transform_indices = @transform_2, window_bounds = array<i64: 1, 128>}, {pipeline_mode = #tpu.pipeline_mode<synchronous>, transform_indices = @transform_3, window_bounds = array<i64: 64, 128>}, {pipeline_mode = #tpu.pipeline_mode<synchronous>, transform_indices = @transform_4, window_bounds = array<i64: 1, 128>}, {pipeline_mode = #tpu.pipeline_mode<synchronous>, transform_indices = @transform_5, window_bounds = array<i64: 3, 128, 128>}, {pipeline_mode = #tpu.pipeline_mode<synchronous>, transform_indices = @transform_6, window_bounds = array<i64: 1, 128>}, {transform_indices = @transform_7, window_bounds = array<i64: 1, 16, 128>}]} {
    %cst = arith.constant 0.000000e+00 : f32
    %0 = vector.broadcast %cst : f32 to vector<1x64xf32>
    %c0 = arith.constant 0 : index
    %c0_0 = arith.constant 0 : index
    %1 = vector.load %arg9[%c0, %c0_0] : memref<18x64xf32, #tpu.memory_space<vmem>>, vector<1x64xf32>
    tpu.vector_store %arg9[%c0, %c0_0], %0 {strides = array<i32>} : memref<18x64xf32, #tpu.memory_space<vmem>>, vector<1x64xf32>,
    %cst_1 = arith.constant 0.000000e+00 : f32
    %2 = vector.broadcast %cst_1 : f32 to vector<1x64xf32>
    %c17 = arith.constant 17 : index
    %c0_2 = arith.constant 0 : index
    %3 = vector.load %arg9[%c17, %c0_2] : memref<18x64xf32, #tpu.memory_space<vmem>>, vector<1x64xf32>
    tpu.vector_store %arg9[%c17, %c0_2], %2 {strides = array<i32>} : memref<18x64xf32, #tpu.memory_space<vmem>>, vector<1x64xf32>,
    %cst_3 = arith.constant 0.000000e+00 : f32
    %4 = vector.broadcast %cst_3 : f32 to vector<1x128xf32>
    %c0_4 = arith.constant 0 : index
    %c0_5 = arith.constant 0 : index
    %5 = vector.load %arg10[%c0_4, %c0_5] : memref<18x128xf32, #tpu.memory_space<vmem>>, vector<1x128xf32>
    tpu.vector_store %arg10[%c0_4, %c0_5], %4 {strides = array<i32>} : memref<18x128xf32, #tpu.memory_space<vmem>>, vector<1x128xf32>,
    %cst_6 = arith.constant 0.000000e+00 : f32
    %6 = vector.broadcast %cst_6 : f32 to vector<1x128xf32>
    %c17_7 = arith.constant 17 : index
    %c0_8 = arith.constant 0 : index
    %7 = vector.load %arg10[%c17_7, %c0_8] : memref<18x128xf32, #tpu.memory_space<vmem>>, vector<1x128xf32>
    tpu.vector_store %arg10[%c17_7, %c0_8], %6 {strides = array<i32>} : memref<18x128xf32, #tpu.memory_space<vmem>>, vector<1x128xf32>,
    %c0_9 = arith.constant 0 : index
    %c0_10 = arith.constant 0 : index
    %c0_11 = arith.constant 0 : index
    %8 = vector.load %arg1[%c0_9, %c0_10, %c0_11] : memref<1x16x64xbf16, #tpu.memory_space<vmem>>, vector<1x16x64xbf16>
    %9 = vector.shape_cast %8 : vector<1x16x64xbf16> to vector<16x64xbf16>
    %10 = arith.extf %9 : vector<16x64xbf16> to vector<16x64xf32>
    %c1 = arith.constant 1 : index
    %c0_12 = arith.constant 0 : index
    %11 = vector.load %arg9[%c1, %c0_12] : memref<18x64xf32, #tpu.memory_space<vmem>>, vector<16x64xf32>
    tpu.vector_store %arg9[%c1, %c0_12], %10 {strides = array<i32>} : memref<18x64xf32, #tpu.memory_space<vmem>>, vector<16x64xf32>,
    %c0_13 = arith.constant 0 : index
    %c0_14 = arith.constant 0 : index
    %12 = vector.load %arg9[%c0_13, %c0_14] : memref<18x64xf32, #tpu.memory_space<vmem>>, vector<16x64xf32>
    %13 = arith.truncf %12 : vector<16x64xf32> to vector<16x64xbf16>
    %c0_15 = arith.constant 0 : index
    %c0_16 = arith.constant 0 : index
    %c0_17 = arith.constant 0 : index
    %14 = vector.load %arg2[%c0_15, %c0_16, %c0_17] : memref<3x64x128xbf16, #tpu.memory_space<vmem>>, vector<1x64x128xbf16>
    %15 = vector.shape_cast %14 : vector<1x64x128xbf16> to vector<64x128xbf16>
    %cst_18 = arith.constant dense<0.000000e+00> : vector<16x128xf32>
    %16 = tpu.matmul %13, %15, %cst_18 {dimension_numbers = #tpu.dot_dimension_numbers<[1], [0], [0], [1], [0, 0, 1, 1], [], []>} : vector<16x64xbf16>, vector<64x128xbf16>, vector<16x128xf32> -> vector<16x128xf32>
    %c1_19 = arith.constant 1 : index
    %c0_20 = arith.constant 0 : index
    %17 = vector.load %arg9[%c1_19, %c0_20] : memref<18x64xf32, #tpu.memory_space<vmem>>, vector<16x64xf32>
    %18 = arith.truncf %17 : vector<16x64xf32> to vector<16x64xbf16>
    %c1_21 = arith.constant 1 : index
    %c0_22 = arith.constant 0 : index
    %c0_23 = arith.constant 0 : index
    %19 = vector.load %arg2[%c1_21, %c0_22, %c0_23] : memref<3x64x128xbf16, #tpu.memory_space<vmem>>, vector<1x64x128xbf16>
    %20 = vector.shape_cast %19 : vector<1x64x128xbf16> to vector<64x128xbf16>
    %cst_24 = arith.constant dense<0.000000e+00> : vector<16x128xf32>
    %21 = tpu.matmul %18, %20, %cst_24 {dimension_numbers = #tpu.dot_dimension_numbers<[1], [0], [0], [1], [0, 0, 1, 1], [], []>} : vector<16x64xbf16>, vector<64x128xbf16>, vector<16x128xf32> -> vector<16x128xf32>
    %22 = arith.addf %16, %21 : vector<16x128xf32>
    %c2 = arith.constant 2 : index
    %c0_25 = arith.constant 0 : index
    %23 = vector.load %arg9[%c2, %c0_25] : memref<18x64xf32, #tpu.memory_space<vmem>>, vector<16x64xf32>
    %24 = arith.truncf %23 : vector<16x64xf32> to vector<16x64xbf16>
    %c2_26 = arith.constant 2 : index
    %c0_27 = arith.constant 0 : index
    %c0_28 = arith.constant 0 : index
    %25 = vector.load %arg2[%c2_26, %c0_27, %c0_28] : memref<3x64x128xbf16, #tpu.memory_space<vmem>>, vector<1x64x128xbf16>
    %26 = vector.shape_cast %25 : vector<1x64x128xbf16> to vector<64x128xbf16>
    %cst_29 = arith.constant dense<0.000000e+00> : vector<16x128xf32>
    %27 = tpu.matmul %24, %26, %cst_29 {dimension_numbers = #tpu.dot_dimension_numbers<[1], [0], [0], [1], [0, 0, 1, 1], [], []>} : vector<16x64xbf16>, vector<64x128xbf16>, vector<16x128xf32> -> vector<16x128xf32>
    %28 = arith.addf %22, %27 : vector<16x128xf32>
    %c0_30 = arith.constant 0 : index
    %c0_31 = arith.constant 0 : index
    %29 = vector.load %arg3[%c0_30, %c0_31] : memref<1x128xf32, #tpu.memory_space<vmem>>, vector<1x128xf32>
    %30 = vector.broadcast %29 : vector<1x128xf32> to vector<16x128xf32>
    %31 = arith.addf %28, %30 : vector<16x128xf32>
    %cst_32 = arith.constant 0.000000e+00 : f32
    %32 = vector.broadcast %cst_32 : f32 to vector<16x128xf32>
    %33 = arith.maximumf %31, %32 : vector<16x128xf32>
    %c1_33 = arith.constant 1 : index
    %c0_34 = arith.constant 0 : index
    %34 = vector.load %arg9[%c1_33, %c0_34] : memref<18x64xf32, #tpu.memory_space<vmem>>, vector<16x64xf32>
    %35 = arith.truncf %34 : vector<16x64xf32> to vector<16x64xbf16>
    %c0_35 = arith.constant 0 : index
    %c0_36 = arith.constant 0 : index
    %36 = vector.load %arg4[%c0_35, %c0_36] : memref<64x128xbf16, #tpu.memory_space<vmem>>, vector<64x128xbf16>
    %cst_37 = arith.constant dense<0.000000e+00> : vector<16x128xf32>
    %37 = tpu.matmul %35, %36, %cst_37 {dimension_numbers = #tpu.dot_dimension_numbers<[1], [0], [0], [1], [0, 0, 1, 1], [], []>} : vector<16x64xbf16>, vector<64x128xbf16>, vector<16x128xf32> -> vector<16x128xf32>
    %c0_38 = arith.constant 0 : index
    %c0_39 = arith.constant 0 : index
    %38 = vector.load %arg5[%c0_38, %c0_39] : memref<1x128xf32, #tpu.memory_space<vmem>>, vector<1x128xf32>
    %39 = vector.broadcast %38 : vector<1x128xf32> to vector<16x128xf32>
    %40 = arith.addf %37, %39 : vector<16x128xf32>
    %c1_40 = arith.constant 1 : index
    %c0_41 = arith.constant 0 : index
    %41 = vector.load %arg10[%c1_40, %c0_41] : memref<18x128xf32, #tpu.memory_space<vmem>>, vector<16x128xf32>
    tpu.vector_store %arg10[%c1_40, %c0_41], %33 {strides = array<i32>} : memref<18x128xf32, #tpu.memory_space<vmem>>, vector<16x128xf32>,
    %c0_42 = arith.constant 0 : index
    %c0_43 = arith.constant 0 : index
    %42 = vector.load %arg10[%c0_42, %c0_43] : memref<18x128xf32, #tpu.memory_space<vmem>>, vector<16x128xf32>
    %43 = arith.truncf %42 : vector<16x128xf32> to vector<16x128xbf16>
    %c0_44 = arith.constant 0 : index
    %c0_45 = arith.constant 0 : index
    %c0_46 = arith.constant 0 : index
    %44 = vector.load %arg6[%c0_44, %c0_45, %c0_46] : memref<3x128x128xbf16, #tpu.memory_space<vmem>>, vector<1x128x128xbf16>
    %45 = vector.shape_cast %44 : vector<1x128x128xbf16> to vector<128x128xbf16>
    %cst_47 = arith.constant dense<0.000000e+00> : vector<16x128xf32>
    %46 = tpu.matmul %43, %45, %cst_47 {dimension_numbers = #tpu.dot_dimension_numbers<[1], [0], [0], [1], [0, 0, 1, 1], [], []>} : vector<16x128xbf16>, vector<128x128xbf16>, vector<16x128xf32> -> vector<16x128xf32>
    %c1_48 = arith.constant 1 : index
    %c0_49 = arith.constant 0 : index
    %47 = vector.load %arg10[%c1_48, %c0_49] : memref<18x128xf32, #tpu.memory_space<vmem>>, vector<16x128xf32>
    %48 = arith.truncf %47 : vector<16x128xf32> to vector<16x128xbf16>
    %c1_50 = arith.constant 1 : index
    %c0_51 = arith.constant 0 : index
    %c0_52 = arith.constant 0 : index
    %49 = vector.load %arg6[%c1_50, %c0_51, %c0_52] : memref<3x128x128xbf16, #tpu.memory_space<vmem>>, vector<1x128x128xbf16>
    %50 = vector.shape_cast %49 : vector<1x128x128xbf16> to vector<128x128xbf16>
    %cst_53 = arith.constant dense<0.000000e+00> : vector<16x128xf32>
    %51 = tpu.matmul %48, %50, %cst_53 {dimension_numbers = #tpu.dot_dimension_numbers<[1], [0], [0], [1], [0, 0, 1, 1], [], []>} : vector<16x128xbf16>, vector<128x128xbf16>, vector<16x128xf32> -> vector<16x128xf32>
    %52 = arith.addf %46, %51 : vector<16x128xf32>
    %c2_54 = arith.constant 2 : index
    %c0_55 = arith.constant 0 : index
    %53 = vector.load %arg10[%c2_54, %c0_55] : memref<18x128xf32, #tpu.memory_space<vmem>>, vector<16x128xf32>
    %54 = arith.truncf %53 : vector<16x128xf32> to vector<16x128xbf16>
    %c2_56 = arith.constant 2 : index
    %c0_57 = arith.constant 0 : index
    %c0_58 = arith.constant 0 : index
    %55 = vector.load %arg6[%c2_56, %c0_57, %c0_58] : memref<3x128x128xbf16, #tpu.memory_space<vmem>>, vector<1x128x128xbf16>
    %56 = vector.shape_cast %55 : vector<1x128x128xbf16> to vector<128x128xbf16>
    %cst_59 = arith.constant dense<0.000000e+00> : vector<16x128xf32>
    %57 = tpu.matmul %54, %56, %cst_59 {dimension_numbers = #tpu.dot_dimension_numbers<[1], [0], [0], [1], [0, 0, 1, 1], [], []>} : vector<16x128xbf16>, vector<128x128xbf16>, vector<16x128xf32> -> vector<16x128xf32>
    %58 = arith.addf %52, %57 : vector<16x128xf32>
    %c0_60 = arith.constant 0 : index
    %c0_61 = arith.constant 0 : index
    %59 = vector.load %arg7[%c0_60, %c0_61] : memref<1x128xf32, #tpu.memory_space<vmem>>, vector<1x128xf32>
    %60 = vector.broadcast %59 : vector<1x128xf32> to vector<16x128xf32>
    %61 = arith.addf %58, %60 : vector<16x128xf32>
    %62 = arith.addf %61, %40 : vector<16x128xf32>
    %cst_62 = arith.constant 0.000000e+00 : f32
    %63 = vector.broadcast %cst_62 : f32 to vector<16x128xf32>
    %64 = arith.maximumf %62, %63 : vector<16x128xf32>
    %c0_63 = arith.constant 0 : index
    %c0_64 = arith.constant 0 : index
    %c0_65 = arith.constant 0 : index
    %65 = vector.load %arg8[%c0_63, %c0_64, %c0_65] : memref<1x16x128xf32, #tpu.memory_space<vmem>>, vector<1x16x128xf32>
    %66 = vector.shape_cast %65 : vector<1x16x128xf32> to vector<16x128xf32>
    %67 = vector.shape_cast %64 : vector<16x128xf32> to vector<1x16x128xf32>
    tpu.vector_store %arg8[%c0_63, %c0_64, %c0_65], %67 {strides = array<i32>} : memref<1x16x128xf32, #tpu.memory_space<vmem>>, vector<1x16x128xf32>,
    return
  }
  func.func @transform_0(%arg0: i32) -> (i32, i32, i32) {
    %c0_i32 = arith.constant 0 : i32
    %c0_i32_0 = arith.constant 0 : i32
    %c0_i32_1 = arith.constant 0 : i32
    return %arg0, %c0_i32, %c0_i32_0 : i32, i32, i32
  }
  func.func @transform_1(%arg0: i32) -> (i32, i32, i32) {
    %c0_i32 = arith.constant 0 : i32
    %c0_i32_0 = arith.constant 0 : i32
    %c0_i32_1 = arith.constant 0 : i32
    %c0_i32_2 = arith.constant 0 : i32
    return %c0_i32, %c0_i32_0, %c0_i32_1 : i32, i32, i32
  }
  func.func @transform_2(%arg0: i32) -> (i32, i32) {
    %c0_i32 = arith.constant 0 : i32
    %c0_i32_0 = arith.constant 0 : i32
    %c0_i32_1 = arith.constant 0 : i32
    return %c0_i32, %c0_i32_0 : i32, i32
  }
  func.func @transform_3(%arg0: i32) -> (i32, i32) {
    %c0_i32 = arith.constant 0 : i32
    %c0_i32_0 = arith.constant 0 : i32
    %c0_i32_1 = arith.constant 0 : i32
    return %c0_i32, %c0_i32_0 : i32, i32
  }
  func.func @transform_4(%arg0: i32) -> (i32, i32) {
    %c0_i32 = arith.constant 0 : i32
    %c0_i32_0 = arith.constant 0 : i32
    %c0_i32_1 = arith.constant 0 : i32
    return %c0_i32, %c0_i32_0 : i32, i32
  }
  func.func @transform_5(%arg0: i32) -> (i32, i32, i32) {
    %c0_i32 = arith.constant 0 : i32
    %c0_i32_0 = arith.constant 0 : i32
    %c0_i32_1 = arith.constant 0 : i32
    %c0_i32_2 = arith.constant 0 : i32
    return %c0_i32, %c0_i32_0, %c0_i32_1 : i32, i32, i32
  }
  func.func @transform_6(%arg0: i32) -> (i32, i32) {
    %c0_i32 = arith.constant 0 : i32
    %c0_i32_0 = arith.constant 0 : i32
    %c0_i32_1 = arith.constant 0 : i32
    return %c0_i32, %c0_i32_0 : i32, i32
  }
  func.func @transform_7(%arg0: i32) -> (i32, i32, i32) {
    %c0_i32 = arith.constant 0 : i32
    %c0_i32_0 = arith.constant 0 : i32
    %c0_i32_1 = arith.constant 0 : i32
    return %arg0, %c0_i32, %c0_i32_0 : i32, i32, i32
  }
}

</mosaic_0001>

<bundles_post_ra>
// kernel: tile.17
= control target key start
LH: loop header
LB: loop body
LE: loop exit
PB: predicated region body
PF: predicated region fallthrough
CT: control target
= control target key end

     0   :  { %s28_s0 = inlined_call_operand.vmem [shape: f32[8], index: 0, kind: input, shape index: {}]   ;;  %s29_s1 = inlined_call_operand.vmem [shape: f32[16,8], index: 1, kind: output, shape index: {}]  }
   0x1   :  { %v4_v0 = vld [vmem:[%s28_s0] ss:$0 sm:$0xff] }
   0x2   :  { %5 = vst [vmem:[%s29_s1] sm:$0xff] %v4_v0  ;;  %8 = vst [vmem:[%s29_s1 + $0x8] sm:$0xff] %v4_v0 }

// kernel: tile.18
= control target key start
LH: loop header
LB: loop body
LE: loop exit
PB: predicated region body
PF: predicated region fallthrough
CT: control target
= control target key end

     0   :  { %s131_s10 = smov 120   ;;  %s132_s11 = smov 104   ;;  %vm3_vm0 = vcmask 64512   ;;  %vm9_vm1 = vcmask 1048512   ;;  %vm15_vm2 = vcmask 982912   ;;  %vm21_vm3 = vcmask 917312   ;;  %s207_s0 = inlined_call_operand.vmem [shape: f32[16,8], index: 0, kind: input, shape index: {}]   ;;  %s208_s1 = inlined_call_operand.vmem [shape: f32[1,128], index: 1, kind: output, shape index: {}]  }
   0x1   :  { %v101_v0 = vld [vmem:[%s207_s0 + $0xf] sm:$0x1]   ;;  %v103_v1 = vld [vmem:[%s207_s0 + $0xd] sm:$0x1]   ;;  %v102_v2 = vld [vmem:[%s207_s0 + $0xe] sm:$0x1]  }
   0x2   :  { %7 = vrot.lane.b32.xlu0 %v101_v0, %s131_s10  ;;  %19 = vrot.lane.b32.xlu1 %v103_v1, %s132_s11  ;;  %v104_v3 = vld [vmem:[%s207_s0 + $0xc] sm:$0x1]   ;;  %s133_s16 = smov 112   ;;  %s134_s17 = smov 96   ;;  %v105_v4 = vld [vmem:[%s207_s0 + $0xb] sm:$0x1]  }
   0x3   :  { %v106_v5 = vld [vmem:[%s207_s0 + $0xa] sm:$0x1]   ;;  %v2_v6 = vld [vmem:[%s207_s0] sm:$0x1]   ;;  %s135_s24 = smov 88   ;;  %s136_s25 = smov 80  }
   0x4   :  { %4 = vst.msk [vmem:[#allocation0] sm:$0x1] %vm3_vm0, %v2_v6   ;;  %v107_v7 = vld [vmem:[%s207_s0 + $0x9] sm:$0x1]   ;;  %v108_v8 = vld [vmem:[%s207_s0 + $0x8] sm:$0x1]  }
   0x5   :  { %s137_s30 = smov 72   ;;  %s138_s2 = smov 64   ;;  %v109_v9 = vld [vmem:[%s207_s0 + $0x7] sm:$0x1]   ;;  %v110_v10 = vld [vmem:[%s207_s0 + $0x6] sm:$0x1]  }
   0x6   :  { %13 = vrot.lane.b32.xlu0 %v102_v2, %s133_s16  ;;  %25 = vrot.lane.b32.xlu1 %v104_v3, %s134_s17  ;;  %s139_s7 = smov 56   ;;  %s140_s8 = smov 48   ;;  %v111_v11 = vld [vmem:[%s207_s0 + $0x5] sm:$0x1]   ;;  %v112_v12 = vld [vmem:[%s207_s0 + $0x4] sm:$0x1]  }
   0x7   :  { %s141_s13 = smov 40   ;;  %s142_s14 = smov 32   ;;  %v113_v13 = vld [vmem:[%s207_s0 + $0x3] sm:$0x1]   ;;  %v114_v14 = vld [vmem:[%s207_s0 + $0x2] sm:$0x1]  }
   0x8   :  { %s143_s19 = smov 24   ;;  %s144_s20 = smov 16   ;;  %v115_v15 = vld [vmem:[%s207_s0 + $0x1] sm:$0x1]   ;;  %vm27_vm4 = vcmask 851712   ;;  %vm33_vm5 = vcmask 786112  }
   0x9   :  { %s145_s0 = smov 8   ;;  %vm39_vm6 = vcmask 720512   ;;  %vm45_vm7 = vcmask 654912   ;;  %vm51_vm8 = vcmask 589312   ;;  %vm57_vm9 = vcmask 523712  }
   0xa   :  { %31 = vrot.lane.b32.xlu0 %v105_v4, %s135_s24  ;;  %37 = vrot.lane.b32.xlu1 %v106_v5, %s136_s25  ;;  %vm63_vm10 = vcmask 458112   ;;  %vm69_vm11 = vcmask 392512   ;;  %vm75_vm12 = vcmask 326912   ;;  %vm81_vm13 = vcmask 261312  }
   0xb   :  { %vm87_vm14 = vcmask 195712   ;;  %vm93_vm15 = vcmask 130112  }
   0xe   :  { %43 = vrot.lane.b32.xlu0 %v107_v7, %s137_s30  ;;  %49 = vrot.lane.b32.xlu1 %v108_v8, %s138_s2 }
  0x12   :  { %55 = vrot.lane.b32.xlu0 %v109_v9, %s139_s7  ;;  %61 = vrot.lane.b32.xlu1 %v110_v10, %s140_s8 }
  0x16   :  { %67 = vrot.lane.b32.xlu0 %v111_v11, %s141_s13  ;;  %73 = vrot.lane.b32.xlu1 %v112_v12, %s142_s14 }
  0x1a   :  { %79 = vrot.lane.b32.xlu0 %v113_v13, %s143_s19  ;;  %85 = vrot.lane.b32.xlu1 %v114_v14, %s144_s20 }
  0x1e   :  { %91 = vrot.lane.b32.xlu0 %v115_v15, %s145_s0 }
  0x74   :  { %v8_v16 = vpop.permute.xlu0 %7   ;;  %v20_v17 = vpop.permute.xlu1 %19  }
  0x75   :  { %10 = vst.msk [vmem:[#allocation0] sm:$0x1] %vm9_vm1, %v8_v16  }
  0x78   :  { %v14_v18 = vpop.permute.xlu0 %13   ;;  %v26_v19 = vpop.permute.xlu1 %25  }
  0x79   :  { %16 = vst.msk [vmem:[#allocation0] sm:$0x1] %vm15_vm2, %v14_v18  }
  0x7a   :  { %22 = vst.msk [vmem:[#allocation0] sm:$0x1] %vm21_vm3, %v20_v17  }
  0x7b   :  { %28 = vst.msk [vmem:[#allocation0] sm:$0x1] %vm27_vm4, %v26_v19  }
  0x7c   :  { %v32_v20 = vpop.permute.xlu0 %31   ;;  %v38_v21 = vpop.permute.xlu1 %37  }
  0x7d   :  { %34 = vst.msk [vmem:[#allocation0] sm:$0x1] %vm33_vm5, %v32_v20  }
  0x7e   :  { %40 = vst.msk [vmem:[#allocation0] sm:$0x1] %vm39_vm6, %v38_v21  }
  0x80   :  { %v44_v22 = vpop.permute.xlu0 %43   ;;  %v50_v23 = vpop.permute.xlu1 %49  }
  0x81   :  { %46 = vst.msk [vmem:[#allocation0] sm:$0x1] %vm45_vm7, %v44_v22  }
  0x82   :  { %52 = vst.msk [vmem:[#allocation0] sm:$0x1] %vm51_vm8, %v50_v23  }
  0x84   :  { %v56_v24 = vpop.permute.xlu0 %55   ;;  %v62_v25 = vpop.permute.xlu1 %61  }
  0x85   :  { %58 = vst.msk [vmem:[#allocation0] sm:$0x1] %vm57_vm9, %v56_v24  }
  0x86   :  { %64 = vst.msk [vmem:[#allocation0] sm:$0x1] %vm63_vm10, %v62_v25  }
  0x88   :  { %v68_v26 = vpop.permute.xlu0 %67   ;;  %v74_v27 = vpop.permute.xlu1 %73  }
  0x89   :  { %70 = vst.msk [vmem:[#allocation0] sm:$0x1] %vm69_vm11, %v68_v26  }
  0x8a   :  { %76 = vst.msk [vmem:[#allocation0] sm:$0x1] %vm75_vm12, %v74_v27  }
  0x8c   :  { %v80_v28 = vpop.permute.xlu0 %79   ;;  %v86_v29 = vpop.permute.xlu1 %85  }
  0x8d   :  { %82 = vst.msk [vmem:[#allocation0] sm:$0x1] %vm81_vm13, %v80_v28  }
  0x8e   :  { %88 = vst.msk [vmem:[#allocation0] sm:$0x1] %vm87_vm14, %v86_v29  }
  0x90   :  { %v92_v30 = vpop.permute.xlu0 %91  }
  0x91   :  { %94 = vst.msk [vmem:[#allocation0] sm:$0x1] %vm93_vm15, %v92_v30  }
  0x98   :  { %v98_v31 = vld [vmem:[#allocation0] sm:$0x1] }
  0x99   :  { %100 = vst [vmem:[%s208_s1] sm:$0x1] %v98_v31 }

// kernel: residual_block_forward.1
= control target key start
LH: loop header
LB: loop body
LE: loop exit
PB: predicated region body
PF: predicated region fallthrough
CT: control target
= control target key end

     0   :  { %s1403_s24 = smov 0   ;;  %s1617_s0 = inlined_call_operand.vmem [shape: bf16[2,16,64], index: 0, kind: input, shape index: {}]   ;;  %s1618_s1 = inlined_call_operand.vmem [shape: bf16[3,64,128], index: 1, kind: input, shape index: {}]   ;;  %s1619_s2 = inlined_call_operand.vmem [shape: f32[1,128], index: 2, kind: input, shape index: {}]   ;;  %s1620_s3 = inlined_call_operand.vmem [shape: bf16[64,128], index: 3, kind: input, shape index: {}]   ;;  %s1621_s4 = inlined_call_operand.vmem [shape: f32[1,128], index: 4, kind: input, shape index: {}]   ;;  %s1622_s5 = inlined_call_operand.vmem [shape: bf16[3,128,128], index: 5, kind: input, shape index: {}]   ;;  %s1623_s6 = inlined_call_operand.vmem [shape: f32[1,128], index: 6, kind: input, shape index: {}]   ;;  %s1624_s7 = inlined_call_operand.vmem [shape: f32[2,16,128], index: 7, kind: output, shape index: {}]  }
   0x1 LB: > { %s1024_s25 = sadd.s32 4294967295, %s1359_s24   ;;  %p1028_p0 = scmp.ge.s32.totalorder %s1359_s24, 1  ;;  %s1359_s24 = sphi %s1403_s24, %s17_s24  }
   0x2   : > { %p237_p1 = scmp.lt.s32.totalorder %s1359_s24, 3 }
   0x4   : > { %p238_p2 = pnand %p1028_p0, %p237_p1 }
   0x5   : > { %v1313_v0 = vld [vmem:[%s1618_s1 + $0x20] sm:$0xff] (!%p238_p2)   ;;  %v1361_v1 = vmov (!%p238_p2), 0.0   ;;  %v1314_v2 = vld [vmem:[%s1618_s1 + $0x28] sm:$0xff] (!%p238_p2)   ;;  %vm1362_vm0 = vmmov (!%p238_p2), 0   ;;  %p269_p3 = scmp.lt.s32.totalorder (!%p238_p2), %s1024_s25, 1  ;;  %vm280_vm1 = vcmask (!%p238_p2), 516096  }
   0x6   : > { %241 = sbr.rel (%p238_p2) target bundleno = 544 (0x220), region = 48  ;;  %1183 = vmatprep.subr.bf16.mxu0 (!%p238_p2), %v1361_v1  ;;  %283 = vst [vmem:[#allocation3] sm:$0x1] (!%p238_p2), %v1361_v1  ;;  %284 = vst [vmem:[#allocation3 + $0x11] sm:$0x1] (!%p238_p2), %v1361_v1  ;;  %1219 = vmatprep.subr.bf16.mxu1 (!%p238_p2), %v1361_v1  ;;  %v1315_v3 = vld [vmem:[%s1618_s1 + $0x30] sm:$0xff] (!%p238_p2)  }
   0x7   : > { %1184 = vmatpush3.bf16.msra.mxu0 (!%p238_p2), %v1313_v0  ;;  %1191 = vmatprep.mubr.msk.bf16.mxu0 (!%p238_p2), %vm1362_vm0, %v1361_v1  ;;  %281 = vst.msk [vmem:[#allocation2] sm:$0x1] (!%p238_p2), %vm280_vm1, %v1361_v1  ;;  %282 = vst.msk [vmem:[#allocation2 + $0x11] sm:$0x1] (!%p238_p2), %vm280_vm1, %v1361_v1  ;;  %vm289_vm2 = vcmask (!%p238_p2), 523264   ;;  %v1316_v7 = vld [vmem:[%s1618_s1 + $0x38] sm:$0xff] (!%p238_p2)  }
   0x8   : > { %1185 = vmatprep.subr.bf16.mxu0 (!%p238_p2), %v1361_v1  ;;  %1227 = vmatprep.mubr.msk.bf16.mxu1 (!%p238_p2), %vm1362_vm0, %v1361_v1  ;;  %v1317_v10 = vld [vmem:[%s1618_s1] sm:$0xff] (!%p238_p2)   ;;  %v1318_v12 = vld [vmem:[%s1618_s1 + $0x8] sm:$0xff] (!%p238_p2)   ;;  %v1319_v13 = vld [vmem:[%s1618_s1 + $0x10] sm:$0xff] (!%p238_p2)  }
   0x9   : > { %v1320_v14 = vld [vmem:[%s1618_s1 + $0x18] sm:$0xff] (!%p238_p2)   ;;  %v1321_v18 = vld [vmem:[%s1618_s1 + $0x40] sm:$0xff] (!%p238_p2)   ;;  %v1322_v19 = vld [vmem:[%s1618_s1 + $0x48] sm:$0xff] (!%p238_p2)  }
   0xa   : > { %v1323_v20 = vld [vmem:[%s1618_s1 + $0x50] sm:$0xff] (!%p238_p2)   ;;  %v1324_v21 = vld [vmem:[%s1618_s1 + $0x58] sm:$0xff] (!%p238_p2)   ;;  %v1325_v25 = vld [vmem:[%s1620_s3] sm:$0xff] (!%p238_p2)  }
   0xb   : > { %1186 = vmatpush3.bf16.msra.mxu0 (!%p238_p2), %v1314_v2  ;;  %1220 = vmatpush3.bf16.msra.mxu1 (!%p238_p2), %v1325_v25  ;;  %v1326_v26 = vld [vmem:[%s1620_s3 + $0x8] sm:$0xff] (!%p238_p2)   ;;  %v1327_v27 = vld [vmem:[%s1620_s3 + $0x10] sm:$0xff] (!%p238_p2)   ;;  %v1328_v28 = vld [vmem:[%s1620_s3 + $0x18] sm:$0xff] (!%p238_p2)  }
   0xc   : > { %1187 = vmatprep.subr.bf16.mxu0 (!%p238_p2), %v1361_v1  ;;  %1221 = vmatprep.subr.bf16.mxu1 (!%p238_p2), %v1361_v1  ;;  %v1330_v29 = vld [vmem:[%s1622_s5 + $0x40] sm:$0xff] (!%p238_p2)   ;;  %v1332_v30 = vld [vmem:[%s1622_s5 + $0x48] sm:$0xff] (!%p238_p2)   ;;  %v1334_v32 = vld [vmem:[%s1622_s5 + $0x50] sm:$0xff] (!%p238_p2)  }
   0xd   : > { %s1626_s25 = smov (!%p269_p3, %s1024_s25), 1  ;;  %v1329_v31 = vld [vmem:[%s1622_s5] sm:$0xff]   ;;  %v1331_v33 = vld [vmem:[%s1622_s5 + $0x8] sm:$0xff]   ;;  %v1336_v34 = vld [vmem:[%s1622_s5 + $0x58] sm:$0xff]  }
   0xe   : > { %s1130_s9 = sshll.u32 %s1626_s25, 3  ;;  %v1333_v35 = vld [vmem:[%s1622_s5 + $0x10] sm:$0xff]   ;;  %v1338_v36 = vld [vmem:[%s1622_s5 + $0x60] sm:$0xff]   ;;  %v1335_v37 = vld [vmem:[%s1622_s5 + $0x18] sm:$0xff]  }
   0xf   : > { %s273_s12 = scalar_lea.vmem %s1617_s0, %s1130_s9  ;;  %1188 = vmatpush3.bf16.msra.mxu0 %v1315_v3  ;;  %1222 = vmatpush3.bf16.msra.mxu1 %v1326_v26  ;;  %v1340_v38 = vld [vmem:[%s1622_s5 + $0x68] sm:$0xff]   ;;  %v1337_v39 = vld [vmem:[%s1622_s5 + $0x20] sm:$0xff]   ;;  %v1342_v40 = vld [vmem:[%s1622_s5 + $0x70] sm:$0xff]   ;;  %s1131_s9 = sshll.u32 %s1626_s25, 4 }
  0x10   : > { %v1133_v4 = vld [vmem:[%s273_s12] sm:$0xff]   ;;  %1189 = vmatprep.subr.bf16.mxu0 %v1361_v1  ;;  %1223 = vmatprep.subr.bf16.mxu1 %v1361_v1  ;;  %v1339_v41 = vld [vmem:[%s1622_s5 + $0x28] sm:$0xff]   ;;  %v1344_v42 = vld [vmem:[%s1622_s5 + $0x78] sm:$0xff]   ;;  %s278_s12 = scalar_lea.vmem %s1624_s7, %s1131_s9 }
  0x11   : > { %v1134_v5 = vunpack.c.l.bf16 %v1133_v4  ;;  %v1135_v6 = vunpack.c.h.bf16 %v1133_v4  ;;  %v1341_v43 = vld [vmem:[%s1622_s5 + $0x30] sm:$0xff]   ;;  %v1343_v44 = vld [vmem:[%s1622_s5 + $0x38] sm:$0xff]   ;;  %v1064_v56 = vld [vmem:[%s1619_s2] ss:$0 sm:$0xff] }
  0x13   : > { %290 = vst.msk [vmem:[#allocation2 + $0x1] sm:$0xff] %vm289_vm2, %v1134_v5  ;;  %291 = vst.msk [vmem:[#allocation2 + $0x9] sm:$0xff] %vm289_vm2, %v1135_v6  ;;  %1190 = vmatpush3.bf16.msra.mxu0 %v1316_v7  ;;  %1224 = vmatpush3.bf16.msra.mxu1 %v1327_v27  ;;  %v1345_v6 = vld [vmem:[%s1622_s5 + $0x80] sm:$0xff]  }
  0x14   : > { %1195 = vmatprep.subr.bf16.mxu0 %v1361_v1  ;;  %1225 = vmatprep.subr.bf16.mxu1 %v1361_v1 }
  0x17   : > { %1226 = vmatpush3.bf16.msra.mxu1 %v1328_v28 }
  0x18   : > { %1251 = vmatprep.subr.bf16.mxu1 %v1361_v1 }
  0x1a   : > { %v303_v8 = vld [vmem:[#allocation2 + $0x1] sm:$0xff]  ;;  %v304_v9 = vld [vmem:[#allocation2 + $0x9] sm:$0xff] }
  0x1b   : > { %v305_v11 = vpack.c.bf16 %v304_v9, %v303_v8  ;;  %v292_v15 = vld [vmem:[#allocation2] sm:$0xff]  ;;  %v293_v16 = vld [vmem:[#allocation2 + $0x8] sm:$0xff]  ;;  %v1347_v9 = vld [vmem:[%s1622_s5 + $0x90] sm:$0xff]  }
  0x1c   : > { %v294_v17 = vpack.c.bf16 %v293_v16, %v292_v15  ;;  %v451_v22 = vld [vmem:[#allocation2 + $0x2] sm:$0xff]  ;;  %v452_v23 = vld [vmem:[#allocation2 + $0xa] sm:$0xff] }
  0x1d   : > { %1192 = vmatmul.mubr.msk.bf16.vlgmr.msra.gmra.mrb[0].mxu0 %vm289_vm2, %v305_v11  ;;  %v453_v24 = vpack.c.bf16 %v452_v23, %v451_v22  ;;  %1228 = vmatmul.mubr.msk.bf16.vlgmr.msra.gmra.mrb[0].mxu1 %vm289_vm2, %v305_v11  ;;  %v1346_v8 = vld [vmem:[%s1622_s5 + $0x88] sm:$0xff]   ;;  %v1349_v11 = vld [vmem:[%s1622_s5 + $0xa0] sm:$0xff]  }
  0x1e   : > { %1196 = vmatpush3.bf16.msra.mxu0 %v1317_v10  ;;  %1203 = vmatprep.mubr.msk.bf16.mxu0 %vm1362_vm0, %v1361_v1  ;;  %v1348_v10 = vld [vmem:[%s1622_s5 + $0x98] sm:$0xff]   ;;  %v1065_v22 = vld [vmem:[%s1621_s4] ss:$0 sm:$0xff] }
  0x1f   : > { %1197 = vmatprep.subr.bf16.mxu0 %v1361_v1  ;;  %1267 = vmatprep.mubr.msk.bf16.mxu1 %vm1362_vm0, %v1361_v1 }
  0x20   : > { %1252 = vmatpush3.bf16.msra.mxu1 %v1329_v31  ;;  %v1127_v31 = vld [vmem:[%s1623_s6] ss:$0 sm:$0xff] }
  0x21   : > { %1253 = vmatprep.subr.bf16.mxu1 %v1361_v1 }
  0x22   : > { %1198 = vmatpush3.bf16.msra.mxu0 %v1318_v12  ;;  %v1350_v12 = vld [vmem:[%s1622_s5 + $0xa8] sm:$0xff]  }
  0x23   : > { %1199 = vmatprep.subr.bf16.mxu0 %v1361_v1 }
  0x24   : > { %1254 = vmatpush3.bf16.msra.mxu1 %v1331_v33 }
  0x25   : > { %1255 = vmatprep.subr.bf16.mxu1 %v1361_v1 }
  0x26   : > { %1200 = vmatpush3.bf16.msra.mxu0 %v1319_v13  ;;  %v1351_v13 = vld [vmem:[%s1622_s5 + $0xb0] sm:$0xff]  }
  0x27   : > { %1201 = vmatprep.subr.bf16.mxu0 %v1361_v1 }
  0x28   : > { %1256 = vmatpush3.bf16.msra.mxu1 %v1333_v35 }
  0x29   : > { %1257 = vmatprep.subr.bf16.mxu1 %v1361_v1 }
  0x2a   : > { %1202 = vmatpush3.bf16.msra.mxu0 %v1320_v14  ;;  %v1352_v14 = vld [vmem:[%s1622_s5 + $0xb8] sm:$0xff]  }
  0x2b   : > { %1207 = vmatprep.subr.bf16.mxu0 %v1361_v1 }
  0x2c   : > { %1258 = vmatpush3.bf16.msra.mxu1 %v1335_v37 }
  0x2d   : > { %1204 = vmatmul.mubr.msk.bf16.vlgmr.msra.gmra.mrb[4].mxu0 %vm289_vm2, %v294_v17  ;;  %1259 = vmatprep.subr.bf16.mxu1 %v1361_v1 }
  0x2e   : > { %1208 = vmatpush3.bf16.msra.mxu0 %v1321_v18  ;;  %1215 = vmatprep.mubr.msk.bf16.mxu0 %vm1362_vm0, %v1361_v1 }
  0x2f   : > { %1209 = vmatprep.subr.bf16.mxu0 %v1361_v1 }
  0x30   : > { %1260 = vmatpush3.bf16.msra.mxu1 %v1337_v39 }
  0x31   : > { %1261 = vmatprep.subr.bf16.mxu1 %v1361_v1 }
  0x32   : > { %1210 = vmatpush3.bf16.msra.mxu0 %v1322_v19 }
  0x33   : > { %1211 = vmatprep.subr.bf16.mxu0 %v1361_v1 }
  0x34   : > { %1262 = vmatpush3.bf16.msra.mxu1 %v1339_v41 }
  0x35   : > { %1263 = vmatprep.subr.bf16.mxu1 %v1361_v1 }
  0x36   : > { %1212 = vmatpush3.bf16.msra.mxu0 %v1323_v20 }
  0x37   : > { %1213 = vmatprep.subr.bf16.mxu0 %v1361_v1 }
  0x38   : > { %1264 = vmatpush3.bf16.msra.mxu1 %v1341_v43 }
  0x39   : > { %1265 = vmatprep.subr.bf16.mxu1 %v1361_v1 }
  0x3a   : > { %1214 = vmatpush3.bf16.msra.mxu0 %v1324_v21 }
  0x3b   : > { %1231 = vmatprep.subr.bf16.mxu0 %v1361_v1 }
  0x3c   : > { %1266 = vmatpush3.bf16.msra.mxu1 %v1343_v44 }
  0x3d   : > { %1216 = vmatmul.mubr.msk.bf16.vlgmr.msra.gmra.mrb[8].mxu0 %vm289_vm2, %v453_v24  ;;  %1271 = vmatprep.subr.bf16.mxu1 %v1361_v1 }
  0x3e   : > { %1247 = vmatprep.mubr.msk.bf16.mxu0 %vm1362_vm0, %v1361_v1  ;;  %1232 = vmatpush3.bf16.msra.mxu0 %v1330_v29 }
  0x3f   : > { %1233 = vmatprep.subr.bf16.mxu0 %v1361_v1 }
  0x42   : > { %1234 = vmatpush3.bf16.msra.mxu0 %v1332_v30 }
  0x43   : > { %1235 = vmatprep.subr.bf16.mxu0 %v1361_v1 }
  0x46   : > { %1236 = vmatpush3.bf16.msra.mxu0 %v1334_v32 }
  0x47   : > { %1237 = vmatprep.subr.bf16.mxu0 %v1361_v1 }
  0x4a   : > { %1238 = vmatpush3.bf16.msra.mxu0 %v1336_v34 }
  0x4b   : > { %1239 = vmatprep.subr.bf16.mxu0 %v1361_v1 }
  0x4e   : > { %1240 = vmatpush3.bf16.msra.mxu0 %v1338_v36 }
  0x4f   : > { %1241 = vmatprep.subr.bf16.mxu0 %v1361_v1 }
  0x52   : > { %1242 = vmatpush3.bf16.msra.mxu0 %v1340_v38 }
  0x53   : > { %1243 = vmatprep.subr.bf16.mxu0 %v1361_v1 }
  0x56   : > { %1244 = vmatpush3.bf16.msra.mxu0 %v1342_v40 }
  0x57   : > { %1245 = vmatprep.subr.bf16.mxu0 %v1361_v1 }
  0x5a   : > { %1246 = vmatpush3.bf16.msra.mxu0 %v1344_v42 }
  0xf0   : > { %v376_v45 = vpop.f32.mrb[0].mxu0  ;;  %v617_v18 = vpop.f32.mrb[0].mxu1 }
  0xf1   : > { %v1193_v46 = vpop.f32.mrb[1].mxu0  ;;  %v1229_v19 = vpop.f32.mrb[1].mxu1  ;;  %v618_v23 = vadd.f32 %v1065_v22, %v617_v18 }
  0xf2   : > { %v379_v47 = vpop.f32.mrb[2].mxu0  ;;  %v620_v20 = vpop.f32.mrb[2].mxu1 }
  0xf3   : > { %v1194_v48 = vpop.f32.mrb[3].mxu0  ;;  %v1230_v21 = vpop.f32.mrb[3].mxu1  ;;  %v621_v25 = vadd.f32 %v1065_v22, %v620_v20 }
 0x100   : > { %v444_v49 = vpop.f32.mrb[4].mxu0 }
 0x101   : > { %v445_v50 = vadd.f32 %v444_v49, %v376_v45  ;;  %v1205_v51 = vpop.f32.mrb[5].mxu0 }
 0x102   : > { %v447_v52 = vpop.f32.mrb[6].mxu0 }
 0x103   : > { %v448_v53 = vadd.f32 %v447_v52, %v379_v47  ;;  %v1206_v54 = vpop.f32.mrb[7].mxu0 }
 0x110   : > { %v524_v55 = vpop.f32.mrb[8].mxu0 }
 0x111   : > { %v531_v57 = vadd.f32 %v524_v55, %v445_v50  ;;  %v1217_v58 = vpop.f32.mrb[9].mxu0 }
 0x112   : > { %v527_v59 = vpop.f32.mrb[10].mxu0 }
 0x113   : > { %v540_v60 = vadd.f32 %v1064_v56, %v531_v57  ;;  %v532_v61 = vadd.f32 %v527_v59, %v448_v53  ;;  %v1218_v62 = vpop.f32.mrb[11].mxu0 }
 0x115   : > { %v542_v63 = vmax.f32 %v540_v60, 0.0  ;;  %v541_v0 = vadd.f32 %v1064_v56, %v532_v61 }
 0x117   : > { %624 = vst [vmem:[#allocation3 + $0x1] sm:$0xff] %v542_v63  ;;  %v543_v2 = vmax.f32 %v541_v0, 0.0 }
 0x119   : > { %625 = vst [vmem:[#allocation3 + $0x9] sm:$0xff] %v543_v2  ;;  %v647_v3 = vpack.c.bf16 %v543_v2, %v542_v63 }
 0x11b   : > { %1248 = vmatmul.mubr.bf16.vlgmr.msra.gmra.mrb[12].mxu0 %v647_v3 }
 0x11e   : > { %v626_v4 = vld [vmem:[#allocation3] sm:$0xff] }
 0x120   : > { %v627_v5 = vld [vmem:[#allocation3 + $0x8] sm:$0xff] }
 0x121   : > { %v628_v7 = vpack.c.bf16 %v627_v5, %v626_v4  ;;  %v843_v15 = vld [vmem:[#allocation3 + $0x2] sm:$0xff]  ;;  %v844_v16 = vld [vmem:[#allocation3 + $0xa] sm:$0xff] }
 0x122   : > { %v845_v17 = vpack.c.bf16 %v844_v16, %v843_v15 }
 0x123   : > { %1268 = vmatmul.mubr.bf16.vlgmr.msra.gmra.mrb[4].mxu1 %v628_v7 }
 0x124   : > { %1272 = vmatpush3.bf16.msra.mxu1 %v1345_v6  ;;  %1287 = vmatprep.mubr.msk.bf16.mxu1 %vm1362_vm0, %v1361_v1 }
 0x125   : > { %1273 = vmatprep.subr.bf16.mxu1 %v1361_v1 }
 0x128   : > { %1274 = vmatpush3.bf16.msra.mxu1 %v1346_v8 }
 0x129   : > { %1275 = vmatprep.subr.bf16.mxu1 %v1361_v1 }
 0x12c   : > { %1276 = vmatpush3.bf16.msra.mxu1 %v1347_v9 }
 0x12d   : > { %1277 = vmatprep.subr.bf16.mxu1 %v1361_v1 }
 0x130   : > { %1278 = vmatpush3.bf16.msra.mxu1 %v1348_v10 }
 0x131   : > { %1279 = vmatprep.subr.bf16.mxu1 %v1361_v1 }
 0x134   : > { %1280 = vmatpush3.bf16.msra.mxu1 %v1349_v11 }
 0x135   : > { %1281 = vmatprep.subr.bf16.mxu1 %v1361_v1 }
 0x138   : > { %1282 = vmatpush3.bf16.msra.mxu1 %v1350_v12 }
 0x139   : > { %1283 = vmatprep.subr.bf16.mxu1 %v1361_v1 }
 0x13c   : > { %1284 = vmatpush3.bf16.msra.mxu1 %v1351_v13 }
 0x13d   : > { %1285 = vmatprep.subr.bf16.mxu1 %v1361_v1 }
 0x140   : > { %1286 = vmatpush3.bf16.msra.mxu1 %v1352_v14 }
 0x143   : > { %1288 = vmatmul.mubr.bf16.vlgmr.msra.gmra.mrb[4].mxu1 %v845_v17 }
 0x1ee   : > { %v747_v24 = vpop.f32.mrb[12].mxu0 }
 0x1ef   : > { %v1292_v26 = vadd.f32 %v747_v24, %v618_v23  ;;  %v1249_v27 = vpop.f32.mrb[13].mxu0 }
 0x1f0   : > { %v750_v1 = vpop.f32.mrb[14].mxu0 }
 0x1f1   : > { %v1296_v28 = vadd.f32 %v750_v1, %v621_v25  ;;  %v1250_v29 = vpop.f32.mrb[15].mxu0 }
 0x216   : > { %v945_v30 = vpop.f32.mrb[4].mxu1 }
 0x217   : > { %v1293_v32 = vadd.f32 %v1292_v26, %v945_v30  ;;  %v1289_v33 = vpop.f32.mrb[5].mxu1 }
 0x218   : > { %v948_v34 = vpop.f32.mrb[6].mxu1 }
 0x219   : > { %v1294_v35 = vadd.f32 %v1293_v32, %v1127_v31  ;;  %v1297_v36 = vadd.f32 %v1296_v28, %v948_v34  ;;  %v1290_v37 = vpop.f32.mrb[7].mxu1 }
 0x21b   : > { %v965_v38 = vmax.f32 %v1294_v35, 0.0  ;;  %v1298_v39 = vadd.f32 %v1297_v36, %v1127_v31 }
 0x21d   : > { %967 = vst [vmem:[%s278_s12] sm:$0xff] %v965_v38  ;;  %v966_v40 = vmax.f32 %v1298_v39, 0.0 }
 0x21f   : > { %968 = vst [vmem:[%s278_s12 + $0x8] sm:$0xff] %v966_v40 }
 0x220 PF: > { %s17_s24 = sadd.s32 1, %s1359_s24  }
 0x221   : > { %p14_p4 = scmp.ge.s32.totalorder %s17_s24, 4  }
 0x223   :  { %16 = sbr.rel (!%p14_p4) target bundleno = 1 (0x1), region = 82 }

</bundles_post_ra>
